<compile_context>
chip_gen: v7x
topology: tpu7x:2x2x1
jax: 0.10.0
libtpu: 0.0.40
codegen_flags: <defaults>
</compile_context>

<pallas_src>
import jax
import jax.numpy as jnp
from jax.experimental import pallas as pl
from jax.experimental.pallas import tpu as pltpu


_LANE = 128        # TPU lane width
_V_CHUNK = 1024    # max one-hot lane width per in-kernel MXU pass


def _round_up(x, m):
    return (x + m - 1) // m * m


def _cdiv(a, b):
    return -(-a // b)


def _gather_dtype_plan(table_dtype):
    """Returns (one-hot dtype, matmul precision, ~MXU passes) for an EXACT gather."""
    if table_dtype == jnp.bfloat16:
        # 0/1 are exact in bf16; bf16 x bf16 with f32 accumulation is exact.
        return jnp.bfloat16, jax.lax.Precision.DEFAULT, 1
    # f32 tables: HIGHEST reconstructs the full 24-bit mantissa of the table values,
    # so onehot @ table reproduces each row bit-exactly.
    return jnp.float32, jax.lax.Precision.HIGHEST, 6


def _vmem_budget_bytes():
    """Generation-aware VMEM budget (~75% of per-core VMEM, capped at 100 MiB)."""
    cap = None
    try:
        info = pltpu.get_tpu_info()
        cap = getattr(info, "vmem_capacity_bytes", None)
    except Exception:
        cap = None
    if not cap:
        cap = 64 * 1024 * 1024  # conservative default: v7x per-TensorCore VMEM
    return min((int(cap) * 3) // 4, 100 * 1024 * 1024)


def _main_working_set_bytes(tr, g, V, D, itemsize, onehot_itemsize):
    """Honest VMEM working set of the one-hot matmul path (lane padding included)."""
    table_b = V * _round_up(D, _LANE) * itemsize                    # 1 copy (Buffered(1))
    idx_b = 2 * tr * _LANE * 4                                      # (tr, g) i32, lane-padded, 2 bufs
    out_b = 2 * tr * _round_up(g * D, _LANE) * itemsize             # 2 output buffers
    onehot_b = tr * _round_up(min(V, _V_CHUNK), _LANE) * onehot_itemsize
    acc_b = 2 * tr * _round_up(D, _LANE) * 4                        # f32 accumulator + dot result
    slack = 2 << 20                                                 # compiler scratch / vreg spill room
    return table_b + idx_b + out_b + onehot_b + acc_b + slack


# ---------------------------------------------------------------------------
# Main path: one-hot @ table on the MXU, table resident (single copy) in VMEM.
# ---------------------------------------------------------------------------
def _onehot_gather_kernel(idx_ref, table_ref, out_ref):
    # idx_ref:   (TR, G)   int32 -- G consecutive token indices folded per row.
    # table_ref: (V, D)          -- full embedding table, resident in VMEM.
    # out_ref:   (TR, G*D)       -- lane-dense output tile.
    tr, g = idx_ref.shape
    v, d = table_ref.shape
    onehot_dtype, precision, _ = _gather_dtype_plan(table_ref.dtype)

    idx = idx_ref[...]
    for j in range(g):                           # static trip count (g = 128 // D or 1)
        idx_j = idx[:, j:j + 1]                  # (TR, 1)
        acc = None
        # Chunk the vocabulary so the one-hot never exceeds (TR, _V_CHUNK): bounds the
        # VMEM/vreg footprint and keeps VPU compares interleaved with MXU pushes.
        for c0 in range(0, v, _V_CHUNK):
            c1 = min(c0 + _V_CHUNK, v)
            iota = jax.lax.broadcasted_iota(jnp.int32, (tr, c1 - c0), 1) + c0
            onehot = (idx_j == iota).astype(onehot_dtype)
            part = jnp.dot(onehot, table_ref[c0:c1, :],
                           preferred_element_type=jnp.float32,
                           precision=precision)
            acc = part if acc is None else acc + part
        # Static lane-slice store; the (TR, G*D) block itself is lane-dense (G*D is a
        # multiple of 128 whenever G > 1) so the writeback DMA uses full stores.
        out_ref[:, j * d:(j + 1) * d] = acc.astype(out_ref.dtype)


# ---------------------------------------------------------------------------
# Fallback path (table too large for VMEM): scalar-prefetched row gather.
# ---------------------------------------------------------------------------
def _row_gather_kernel(idx_sref, row_ref, out_ref):
    del idx_sref  # only consumed by the index_maps
    out_ref[...] = row_ref[...]


def recipe_encoder_forward(recipe_indices, embedding_table, *, tile_tokens=None):
    """Pallas equivalent of RecipeEncoder.forward.

    Args:
      recipe_indices: int array [batch, seq]
      embedding_table: float array [num_heuristics, embedding_dim]
    Returns:
      [batch, seq, embedding_dim] embeddings (same dtype as embedding_table).
    """
    B, S = recipe_indices.shape
    V, D = embedding_table.shape
    n = B * S
    dtype = embedding_table.dtype
    itemsize = jnp.dtype(dtype).itemsize
    onehot_dtype, _, mxu_passes = _gather_dtype_plan(dtype)
    onehot_itemsize = jnp.dtype(onehot_dtype).itemsize

    # Fold g consecutive tokens into the lane axis when D divides 128 (lane-dense out).
    g = _LANE // D if (D < _LANE and _LANE % D == 0) else 1
    pack = 16 if itemsize < 4 else 8                 # sublane pack of the output dtype

    vmem_limit = _vmem_budget_bytes()
    if tile_tokens is None:
        tile_tokens = 2048 if vmem_limit > (64 << 20) else 1024

    # Largest row tile (tr rows of g tokens each) whose working set fits the budget.
    tr_needed = _round_up(_cdiv(n, g), pack)
    tr = min(tr_needed, max(pack, _round_up(_cdiv(tile_tokens, g), pack)))
    while tr > pack and _main_working_set_bytes(tr, g, V, D, itemsize, onehot_itemsize) > vmem_limit:
        tr = max(pack, _round_up(tr // 2, pack))
    main_fits = _main_working_set_bytes(tr, g, V, D, itemsize, onehot_itemsize) <= vmem_limit

    flat_idx = recipe_indices.reshape(-1).astype(jnp.int32)

    if main_fits:
        n_rows_pad = _round_up(_cdiv(n, g), tr)
        n_pad = n_rows_pad * g
        idx_flat = flat_idx
        if n_pad != n:
            idx_flat = jnp.pad(idx_flat, (0, n_pad - n))     # pad with row 0 (valid)
        idx2d = idx_flat.reshape(n_rows_pad, g)
        n_tiles = n_rows_pad // tr

        # Megacore sharding duplicates the table DMA per core; skip it for tiny grids.
        dim_sem = ("arbitrary",) if n_tiles <= 2 else ("parallel",)
        cost = pl.CostEstimate(
            flops=2 * n_pad * V * D * mxu_passes,
            transcendentals=0,
            bytes_accessed=V * D * itemsize + n_pad * 4 + n_pad * D * itemsize,
        )

        def _call_main(table_spec):
            return pl.pallas_call(
                _onehot_gather_kernel,
                out_shape=jax.ShapeDtypeStruct((n_rows_pad, g * D), dtype),
                grid_spec=pltpu.PrefetchScalarGridSpec(
                    num_scalar_prefetch=0,
                    grid=(n_tiles,),
                    in_specs=[
                        pl.BlockSpec((tr, g), lambda i: (i, 0)),
                        table_spec,
                    ],
                    out_specs=pl.BlockSpec((tr, g * D), lambda i: (i, 0)),
                ),
                compiler_params=pltpu.CompilerParams(
                    dimension_semantics=dim_sem,
                    vmem_limit_bytes=vmem_limit,
                ),
                cost_estimate=cost,
            )(idx2d, embedding_table)

        try:
            # Table block index is constant across the grid -> single-buffer it.
            out2d = _call_main(pl.BlockSpec((V, D), lambda i: (0, 0),
                                            pipeline_mode=pl.Buffered(1)))
        except Exception:
            # Graceful degradation if single-buffering is unsupported in this jax.
            out2d = _call_main(pl.BlockSpec((V, D), lambda i: (0, 0)))

        out_flat = out2d.reshape(n_pad, D)[:n]
    else:
        # Large-table fallback: one data-dependent (1, D) row DMA per token.
        # TODO(synk): also route small-n / huge-V cases here even when the table fits,
        # since this path reads only n*D table bytes instead of V*D.
        idx_flat = jnp.clip(flat_idx, 0, V - 1)   # avoid OOB row DMAs (torch would raise)
        out_flat = pl.pallas_call(
            _row_gather_kernel,
            out_shape=jax.ShapeDtypeStruct((n, D), dtype),
            grid_spec=pltpu.PrefetchScalarGridSpec(
                num_scalar_prefetch=1,
                grid=(n,),
                in_specs=[pl.BlockSpec((1, D), lambda i, idx_ref: (idx_ref[i], 0))],
                out_specs=pl.BlockSpec((1, D), lambda i, idx_ref: (i, 0)),
            ),
            compiler_params=pltpu.CompilerParams(
                dimension_semantics=("arbitrary",),
                vmem_limit_bytes=vmem_limit,
            ),
        )(idx_flat, embedding_table)

    return out_flat.reshape(B, S, D)


if __name__ == "__main__":
    # Small, deterministic configuration consistent with the module.
    num_heuristics = 16
    embedding_dim = 32
    batch_size = 2
    seq_len = 8

    key = jax.random.PRNGKey(0)
    k_emb, k_idx = jax.random.split(key)

    # nn.Embedding default init: weight ~ N(0, 1)
    embedding_table = jax.random.normal(
        k_emb, (num_heuristics, embedding_dim), dtype=jnp.float32
    )
    recipe_indices = jax.random.randint(
        k_idx, (batch_size, seq_len), 0, num_heuristics, dtype=jnp.int32
    )

    out = recipe_encoder_forward(recipe_indices, embedding_table)
    out = jax.block_until_ready(out)

    # Correctness check against plain-JAX reference (torch embedding == take).
    ref = jnp.take(embedding_table, recipe_indices, axis=0)
    assert out.shape == (batch_size, seq_len, embedding_dim)
    assert jnp.allclose(out, ref, atol=1e-6, rtol=1e-6), float(
        jnp.max(jnp.abs(out - ref))
    )

    print("KERNEL_OK")
</pallas_src>

<mosaic_0001>
module attributes {stable_mosaic.version = 11 : i64} {
  func.func @_onehot_gather_kernel(%arg0: i32, %arg1: memref<8x4xi32, #tpu.memory_space<vmem>>, %arg2: memref<16x32xf32, #tpu.memory_space<vmem>>, %arg3: memref<8x128xf32, #tpu.memory_space<vmem>>) attributes {dimension_semantics = [#tpu.dimension_semantics<arbitrary>], iteration_bounds = array<i64: 1>, scalar_prefetch = 0 : i64, scratch_operands = 0 : i64, tpu.core_type = #tpu.core_type<tc>, window_params = [{transform_indices = @transform_0, window_bounds = array<i64: 8, 4>}, {pipeline_mode = #tpu.pipeline_mode<synchronous>, transform_indices = @transform_1, window_bounds = array<i64: 16, 32>}, {transform_indices = @transform_2, window_bounds = array<i64: 8, 128>}]} {
    %c0 = arith.constant 0 : index
    %c0_0 = arith.constant 0 : index
    %0 = vector.load %arg1[%c0, %c0_0] : memref<8x4xi32, #tpu.memory_space<vmem>>, vector<8x4xi32>
    %1 = vector.extract_strided_slice %0 {offsets = [0, 0], sizes = [8, 1], strides = [1, 1]} : vector<8x4xi32> to vector<8x1xi32>
    %2 = tpu.iota {dimensions = array<i32: 1>} : vector<8x16xi32>
    %c0_i32 = arith.constant 0 : i32
    %3 = vector.broadcast %c0_i32 : i32 to vector<8x16xi32>
    %4 = arith.addi %2, %3 : vector<8x16xi32>
    %5 = vector.broadcast %1 : vector<8x1xi32> to vector<8x16xi32>
    %6 = arith.cmpi eq, %5, %4 : vector<8x16xi32>
    %7 = arith.extui %6 : vector<8x16xi1> to vector<8x16xi32>
    %8 = arith.sitofp %7 : vector<8x16xi32> to vector<8x16xf32>
    %c0_1 = arith.constant 0 : index
    %c0_2 = arith.constant 0 : index
    %9 = vector.load %arg2[%c0_1, %c0_2] : memref<16x32xf32, #tpu.memory_space<vmem>>, vector<16x32xf32>
    %cst = arith.constant dense<0.000000e+00> : vector<8x32xf32>
    %10 = tpu.matmul %8, %9, %cst {dimension_numbers = #tpu.dot_dimension_numbers<[1], [0], [0], [1], [0, 0, 1, 1], [], []>, precision = #tpu.contract_precision<fp32>} : vector<8x16xf32>, vector<16x32xf32>, vector<8x32xf32> -> vector<8x32xf32>
    %c0_3 = arith.constant 0 : index
    %c0_4 = arith.constant 0 : index
    %11 = vector.load %arg3[%c0_3, %c0_4] : memref<8x128xf32, #tpu.memory_space<vmem>>, vector<8x32xf32>
    tpu.vector_store %arg3[%c0_3, %c0_4], %10 {strides = array<i32>} : memref<8x128xf32, #tpu.memory_space<vmem>>, vector<8x32xf32>,
    %12 = vector.extract_strided_slice %0 {offsets = [0, 1], sizes = [8, 1], strides = [1, 1]} : vector<8x4xi32> to vector<8x1xi32>
    %13 = tpu.iota {dimensions = array<i32: 1>} : vector<8x16xi32>
    %c0_i32_5 = arith.constant 0 : i32
    %14 = vector.broadcast %c0_i32_5 : i32 to vector<8x16xi32>
    %15 = arith.addi %13, %14 : vector<8x16xi32>
    %16 = vector.broadcast %12 : vector<8x1xi32> to vector<8x16xi32>
    %17 = arith.cmpi eq, %16, %15 : vector<8x16xi32>
    %18 = arith.extui %17 : vector<8x16xi1> to vector<8x16xi32>
    %19 = arith.sitofp %18 : vector<8x16xi32> to vector<8x16xf32>
    %c0_6 = arith.constant 0 : index
    %c0_7 = arith.constant 0 : index
    %20 = vector.load %arg2[%c0_6, %c0_7] : memref<16x32xf32, #tpu.memory_space<vmem>>, vector<16x32xf32>
    %cst_8 = arith.constant dense<0.000000e+00> : vector<8x32xf32>
    %21 = tpu.matmul %19, %20, %cst_8 {dimension_numbers = #tpu.dot_dimension_numbers<[1], [0], [0], [1], [0, 0, 1, 1], [], []>, precision = #tpu.contract_precision<fp32>} : vector<8x16xf32>, vector<16x32xf32>, vector<8x32xf32> -> vector<8x32xf32>
    %c0_9 = arith.constant 0 : index
    %c32 = arith.constant 32 : index
    %22 = vector.load %arg3[%c0_9, %c32] : memref<8x128xf32, #tpu.memory_space<vmem>>, vector<8x32xf32>
    tpu.vector_store %arg3[%c0_9, %c32], %21 {strides = array<i32>} : memref<8x128xf32, #tpu.memory_space<vmem>>, vector<8x32xf32>,
    %23 = vector.extract_strided_slice %0 {offsets = [0, 2], sizes = [8, 1], strides = [1, 1]} : vector<8x4xi32> to vector<8x1xi32>
    %24 = tpu.iota {dimensions = array<i32: 1>} : vector<8x16xi32>
    %c0_i32_10 = arith.constant 0 : i32
    %25 = vector.broadcast %c0_i32_10 : i32 to vector<8x16xi32>
    %26 = arith.addi %24, %25 : vector<8x16xi32>
    %27 = vector.broadcast %23 : vector<8x1xi32> to vector<8x16xi32>
    %28 = arith.cmpi eq, %27, %26 : vector<8x16xi32>
    %29 = arith.extui %28 : vector<8x16xi1> to vector<8x16xi32>
    %30 = arith.sitofp %29 : vector<8x16xi32> to vector<8x16xf32>
    %c0_11 = arith.constant 0 : index
    %c0_12 = arith.constant 0 : index
    %31 = vector.load %arg2[%c0_11, %c0_12] : memref<16x32xf32, #tpu.memory_space<vmem>>, vector<16x32xf32>
    %cst_13 = arith.constant dense<0.000000e+00> : vector<8x32xf32>
    %32 = tpu.matmul %30, %31, %cst_13 {dimension_numbers = #tpu.dot_dimension_numbers<[1], [0], [0], [1], [0, 0, 1, 1], [], []>, precision = #tpu.contract_precision<fp32>} : vector<8x16xf32>, vector<16x32xf32>, vector<8x32xf32> -> vector<8x32xf32>
    %c0_14 = arith.constant 0 : index
    %c64 = arith.constant 64 : index
    %33 = vector.load %arg3[%c0_14, %c64] : memref<8x128xf32, #tpu.memory_space<vmem>>, vector<8x32xf32>
    tpu.vector_store %arg3[%c0_14, %c64], %32 {strides = array<i32>} : memref<8x128xf32, #tpu.memory_space<vmem>>, vector<8x32xf32>,
    %34 = vector.extract_strided_slice %0 {offsets = [0, 3], sizes = [8, 1], strides = [1, 1]} : vector<8x4xi32> to vector<8x1xi32>
    %35 = tpu.iota {dimensions = array<i32: 1>} : vector<8x16xi32>
    %c0_i32_15 = arith.constant 0 : i32
    %36 = vector.broadcast %c0_i32_15 : i32 to vector<8x16xi32>
    %37 = arith.addi %35, %36 : vector<8x16xi32>
    %38 = vector.broadcast %34 : vector<8x1xi32> to vector<8x16xi32>
    %39 = arith.cmpi eq, %38, %37 : vector<8x16xi32>
    %40 = arith.extui %39 : vector<8x16xi1> to vector<8x16xi32>
    %41 = arith.sitofp %40 : vector<8x16xi32> to vector<8x16xf32>
    %c0_16 = arith.constant 0 : index
    %c0_17 = arith.constant 0 : index
    %42 = vector.load %arg2[%c0_16, %c0_17] : memref<16x32xf32, #tpu.memory_space<vmem>>, vector<16x32xf32>
    %cst_18 = arith.constant dense<0.000000e+00> : vector<8x32xf32>
    %43 = tpu.matmul %41, %42, %cst_18 {dimension_numbers = #tpu.dot_dimension_numbers<[1], [0], [0], [1], [0, 0, 1, 1], [], []>, precision = #tpu.contract_precision<fp32>} : vector<8x16xf32>, vector<16x32xf32>, vector<8x32xf32> -> vector<8x32xf32>
    %c0_19 = arith.constant 0 : index
    %c96 = arith.constant 96 : index
    %44 = vector.load %arg3[%c0_19, %c96] : memref<8x128xf32, #tpu.memory_space<vmem>>, vector<8x32xf32>
    tpu.vector_store %arg3[%c0_19, %c96], %43 {strides = array<i32>} : memref<8x128xf32, #tpu.memory_space<vmem>>, vector<8x32xf32>,
    return
  }
  func.func @transform_0(%arg0: i32) -> (i32, i32) {
    %c0_i32 = arith.constant 0 : i32
    %c0_i32_0 = arith.constant 0 : i32
    return %arg0, %c0_i32 : i32, i32
  }
  func.func @transform_1(%arg0: i32) -> (i32, i32) {
    %c0_i32 = arith.constant 0 : i32
    %c0_i32_0 = arith.constant 0 : i32
    %c0_i32_1 = arith.constant 0 : i32
    return %c0_i32, %c0_i32_0 : i32, i32
  }
  func.func @transform_2(%arg0: i32) -> (i32, i32) {
    %c0_i32 = arith.constant 0 : i32
    %c0_i32_0 = arith.constant 0 : i32
    return %arg0, %c0_i32 : i32, i32
  }
}

module attributes {stable_mosaic.version = 11 : i64} {
  func.func @_onehot_gather_kernel(%arg0: i32, %arg1: memref<8x4xi32, #tpu.memory_space<vmem>>, %arg2: memref<16x32xf32, #tpu.memory_space<vmem>>, %arg3: memref<8x128xf32, #tpu.memory_space<vmem>>) attributes {dimension_semantics = [#tpu.dimension_semantics<arbitrary>], iteration_bounds = array<i64: 1>, scalar_prefetch = 0 : i64, scratch_operands = 0 : i64, tpu.core_type = #tpu.core_type<tc>, window_params = [{transform_indices = @transform_0, window_bounds = array<i64: 8, 4>}, {pipeline_mode = #tpu.pipeline_mode<synchronous>, transform_indices = @transform_1, window_bounds = array<i64: 16, 32>}, {transform_indices = @transform_2, window_bounds = array<i64: 8, 128>}]} {
    %c0 = arith.constant 0 : index
    %c0_0 = arith.constant 0 : index
    %0 = vector.load %arg1[%c0, %c0_0] : memref<8x4xi32, #tpu.memory_space<vmem>>, vector<8x4xi32>
    %1 = vector.extract_strided_slice %0 {offsets = [0, 0], sizes = [8, 1], strides = [1, 1]} : vector<8x4xi32> to vector<8x1xi32>
    %2 = tpu.iota {dimensions = array<i32: 1>} : vector<8x16xi32>
    %c0_i32 = arith.constant 0 : i32
    %3 = vector.broadcast %c0_i32 : i32 to vector<8x16xi32>
    %4 = arith.addi %2, %3 : vector<8x16xi32>
    %5 = vector.broadcast %1 : vector<8x1xi32> to vector<8x16xi32>
    %6 = arith.cmpi eq, %5, %4 : vector<8x16xi32>
    %7 = arith.extui %6 : vector<8x16xi1> to vector<8x16xi32>
    %8 = arith.sitofp %7 : vector<8x16xi32> to vector<8x16xf32>
    %c0_1 = arith.constant 0 : index
    %c0_2 = arith.constant 0 : index
    %9 = vector.load %arg2[%c0_1, %c0_2] : memref<16x32xf32, #tpu.memory_space<vmem>>, vector<16x32xf32>
    %cst = arith.constant dense<0.000000e+00> : vector<8x32xf32>
    %10 = tpu.matmul %8, %9, %cst {dimension_numbers = #tpu.dot_dimension_numbers<[1], [0], [0], [1], [0, 0, 1, 1], [], []>, precision = #tpu.contract_precision<fp32>} : vector<8x16xf32>, vector<16x32xf32>, vector<8x32xf32> -> vector<8x32xf32>
    %c0_3 = arith.constant 0 : index
    %c0_4 = arith.constant 0 : index
    %11 = vector.load %arg3[%c0_3, %c0_4] : memref<8x128xf32, #tpu.memory_space<vmem>>, vector<8x32xf32>
    tpu.vector_store %arg3[%c0_3, %c0_4], %10 {strides = array<i32>} : memref<8x128xf32, #tpu.memory_space<vmem>>, vector<8x32xf32>,
    %12 = vector.extract_strided_slice %0 {offsets = [0, 1], sizes = [8, 1], strides = [1, 1]} : vector<8x4xi32> to vector<8x1xi32>
    %13 = tpu.iota {dimensions = array<i32: 1>} : vector<8x16xi32>
    %c0_i32_5 = arith.constant 0 : i32
    %14 = vector.broadcast %c0_i32_5 : i32 to vector<8x16xi32>
    %15 = arith.addi %13, %14 : vector<8x16xi32>
    %16 = vector.broadcast %12 : vector<8x1xi32> to vector<8x16xi32>
    %17 = arith.cmpi eq, %16, %15 : vector<8x16xi32>
    %18 = arith.extui %17 : vector<8x16xi1> to vector<8x16xi32>
    %19 = arith.sitofp %18 : vector<8x16xi32> to vector<8x16xf32>
    %c0_6 = arith.constant 0 : index
    %c0_7 = arith.constant 0 : index
    %20 = vector.load %arg2[%c0_6, %c0_7] : memref<16x32xf32, #tpu.memory_space<vmem>>, vector<16x32xf32>
    %cst_8 = arith.constant dense<0.000000e+00> : vector<8x32xf32>
    %21 = tpu.matmul %19, %20, %cst_8 {dimension_numbers = #tpu.dot_dimension_numbers<[1], [0], [0], [1], [0, 0, 1, 1], [], []>, precision = #tpu.contract_precision<fp32>} : vector<8x16xf32>, vector<16x32xf32>, vector<8x32xf32> -> vector<8x32xf32>
    %c0_9 = arith.constant 0 : index
    %c32 = arith.constant 32 : index
    %22 = vector.load %arg3[%c0_9, %c32] : memref<8x128xf32, #tpu.memory_space<vmem>>, vector<8x32xf32>
    tpu.vector_store %arg3[%c0_9, %c32], %21 {strides = array<i32>} : memref<8x128xf32, #tpu.memory_space<vmem>>, vector<8x32xf32>,
    %23 = vector.extract_strided_slice %0 {offsets = [0, 2], sizes = [8, 1], strides = [1, 1]} : vector<8x4xi32> to vector<8x1xi32>
    %24 = tpu.iota {dimensions = array<i32: 1>} : vector<8x16xi32>
    %c0_i32_10 = arith.constant 0 : i32
    %25 = vector.broadcast %c0_i32_10 : i32 to vector<8x16xi32>
    %26 = arith.addi %24, %25 : vector<8x16xi32>
    %27 = vector.broadcast %23 : vector<8x1xi32> to vector<8x16xi32>
    %28 = arith.cmpi eq, %27, %26 : vector<8x16xi32>
    %29 = arith.extui %28 : vector<8x16xi1> to vector<8x16xi32>
    %30 = arith.sitofp %29 : vector<8x16xi32> to vector<8x16xf32>
    %c0_11 = arith.constant 0 : index
    %c0_12 = arith.constant 0 : index
    %31 = vector.load %arg2[%c0_11, %c0_12] : memref<16x32xf32, #tpu.memory_space<vmem>>, vector<16x32xf32>
    %cst_13 = arith.constant dense<0.000000e+00> : vector<8x32xf32>
    %32 = tpu.matmul %30, %31, %cst_13 {dimension_numbers = #tpu.dot_dimension_numbers<[1], [0], [0], [1], [0, 0, 1, 1], [], []>, precision = #tpu.contract_precision<fp32>} : vector<8x16xf32>, vector<16x32xf32>, vector<8x32xf32> -> vector<8x32xf32>
    %c0_14 = arith.constant 0 : index
    %c64 = arith.constant 64 : index
    %33 = vector.load %arg3[%c0_14, %c64] : memref<8x128xf32, #tpu.memory_space<vmem>>, vector<8x32xf32>
    tpu.vector_store %arg3[%c0_14, %c64], %32 {strides = array<i32>} : memref<8x128xf32, #tpu.memory_space<vmem>>, vector<8x32xf32>,
    %34 = vector.extract_strided_slice %0 {offsets = [0, 3], sizes = [8, 1], strides = [1, 1]} : vector<8x4xi32> to vector<8x1xi32>
    %35 = tpu.iota {dimensions = array<i32: 1>} : vector<8x16xi32>
    %c0_i32_15 = arith.constant 0 : i32
    %36 = vector.broadcast %c0_i32_15 : i32 to vector<8x16xi32>
    %37 = arith.addi %35, %36 : vector<8x16xi32>
    %38 = vector.broadcast %34 : vector<8x1xi32> to vector<8x16xi32>
    %39 = arith.cmpi eq, %38, %37 : vector<8x16xi32>
    %40 = arith.extui %39 : vector<8x16xi1> to vector<8x16xi32>
    %41 = arith.sitofp %40 : vector<8x16xi32> to vector<8x16xf32>
    %c0_16 = arith.constant 0 : index
    %c0_17 = arith.constant 0 : index
    %42 = vector.load %arg2[%c0_16, %c0_17] : memref<16x32xf32, #tpu.memory_space<vmem>>, vector<16x32xf32>
    %cst_18 = arith.constant dense<0.000000e+00> : vector<8x32xf32>
    %43 = tpu.matmul %41, %42, %cst_18 {dimension_numbers = #tpu.dot_dimension_numbers<[1], [0], [0], [1], [0, 0, 1, 1], [], []>, precision = #tpu.contract_precision<fp32>} : vector<8x16xf32>, vector<16x32xf32>, vector<8x32xf32> -> vector<8x32xf32>
    %c0_19 = arith.constant 0 : index
    %c96 = arith.constant 96 : index
    %44 = vector.load %arg3[%c0_19, %c96] : memref<8x128xf32, #tpu.memory_space<vmem>>, vector<8x32xf32>
    tpu.vector_store %arg3[%c0_19, %c96], %43 {strides = array<i32>} : memref<8x128xf32, #tpu.memory_space<vmem>>, vector<8x32xf32>,
    return
  }
  func.func @transform_0(%arg0: i32) -> (i32, i32) {
    %c0_i32 = arith.constant 0 : i32
    %c0_i32_0 = arith.constant 0 : i32
    return %arg0, %c0_i32 : i32, i32
  }
  func.func @transform_1(%arg0: i32) -> (i32, i32) {
    %c0_i32 = arith.constant 0 : i32
    %c0_i32_0 = arith.constant 0 : i32
    %c0_i32_1 = arith.constant 0 : i32
    return %c0_i32, %c0_i32_0 : i32, i32
  }
  func.func @transform_2(%arg0: i32) -> (i32, i32) {
    %c0_i32 = arith.constant 0 : i32
    %c0_i32_0 = arith.constant 0 : i32
    return %arg0, %c0_i32 : i32, i32
  }
}

</mosaic_0001>

<bundles_post_ra>
// kernel: tpu_custom_call.1
= control target key start
LH: loop header
LB: loop body
LE: loop exit
PB: predicated region body
PF: predicated region fallthrough
CT: control target
= control target key end

     0   :  { %7 = vsyncpa [#allocation3], 0  ;;  %s2584_s0 = inlined_call_operand.vmem [shape: s32[8,4], index: 0, kind: input, shape index: {}]   ;;  %s2585_s1 = inlined_call_operand.hbm [shape: f32[16,32], index: 1, kind: input, shape index: {}]   ;;  %s2586_s2 = inlined_call_operand.hbm [shape: f32[8,128], index: 2, kind: output, shape index: {}]  }
   0x1   :  { %8 = vsyncpa [#allocation4], 0  ;;  %s2380_s9 = smov [#allocation2]   ;;  %s2332_s13 = scalar_lea.hbm %s2585_s1, 256 }
   0x2   :  { %s16_s10 = sshll.u32 %s2380_s9, 4  ;;  %p2333_p0 = scmp.ne.s32.totalorder %s2585_s1, %s2332_s13  ;;  %s17_s10 = int_to_ptr.vmem [resolvable:$true] %s16_s10 }
   0x3   :  { %p2336_p1 = scmp.lt.u32.totalorder %s2332_s13, %s2585_s1 }
   0x5   :  { %p2338_p2 = pnand %p2336_p1, %p2333_p0 }
   0x7   :  { %2341 = shalt.err (!%p2338_p2)
}
   0x8   :  { %s2342_s18 = scalar_lea.vmem %s17_s10, 256  ;;  %p2347_p4 = scmp.lt.s32.totalorder %s17_s10, %s17_s10 }
   0x9   :  { %p2343_p3 = scmp.ne.s32.totalorder %s17_s10, %s2342_s18  ;;  %p2348_p5 = scmp.lt.s32.totalorder %s2342_s18, %s2342_s18 }
   0xb   :  { %p2349_p6 = por %p2348_p5, %p2347_p4 }
   0xd   :  { %p2350_p7 = pnand %p2349_p6, %p2343_p3 }
   0xf   :  { %2353 = shalt.err (!%p2350_p7)
}
  0x10   :  { %s2381_s19 = smov 128   ;;  %s2382_s20 = smov 8  }
  0x11   :  { %22 = dma.hbm_to_vmem [thread:$0]  %s2585_s1, 256, %s17_s10, [#allocation3], %s2381_s19, %s2381_s19, %s2382_s20  }
  0x12   :  { %2376 = dma.done.wait [#allocation3], 256  }
  0x13   :  { %2377 = vsyncadd [#allocation3], 4294967040  ;;  %v2383_v0 = vmov 0   ;;  %v2384_v1 = vmov 2   ;;  %v26_v2 = vld [vmem:[%s2584_s0] sm:$0xff]  ;;  %v36_v4 = vld [vmem:[#allocation2 + $0x8] sm:$0xff]  ;;  %v27_v23 = vlaneseq }
  0x14   :  { %2327 = vset.pattern.permute.xlu0 %v2383_v0  ;;  %2329 = vset.pattern.permute.xlu1 %v2384_v1  ;;  %v35_v3 = vld [vmem:[#allocation2] sm:$0xff]  ;;  %v2385_v5 = vmov 1   ;;  %v2386_v6 = vmov 3   ;;  %v45_v8 = vand.u32 4294901760, %v36_v4  ;;  %v2387_v12 = vmov 0.0|0.0   ;;  %s2390_s0 = smov 32  }
  0x15   :  { %30 = vperm.xlu0 %2327, %v26_v2   ;;  %979 = vperm.xlu1 %2329, %v26_v2   ;;  %v42_v7 = vand.u32 4294901760, %v35_v3  ;;  %vm2388_vm0 = vmmov 0   ;;  %v2389_v15 = vmov 0.0   ;;  %v28_v24 = vand.u32 127, %v27_v23  ;;  %s2391_s1 = smov 64   ;;  %s2392_s25 = smov 96  }
  0x16   :  { %v127_v11 = vsub.f32 %v36_v4, %v45_v8  ;;  %2201 = vmatprep.subr.bf16.mxu0 %v2387_v12  ;;  %2219 = vmatprep.subr.bf16.mxu1 %v2387_v12  ;;  %vm37_vm1 = vcmask 130048   ;;  %vm500_vm6 = vcmask 261120   ;;  %vm976_vm7 = vcmask 523520   ;;  %s2393_s26 = smov [#allocation5]  }
  0x17   :  { %v2424_v9 = vpack.c.bf16 %v45_v8, %v42_v7  ;;  %v120_v10 = vsub.f32 %v35_v3, %v42_v7  ;;  %2037 = vmatprep.mubr.msk.f32.mxu0 %vm2388_vm0, %v2389_v15  ;;  %2079 = vmatprep.mubr.msk.f32.mxu1 %vm2388_vm0, %v2389_v15  ;;  %vm1452_vm8 = vcmask 785920   ;;  %s1936_s27 = sshll.u32 %s2393_s26, 4  ;;  %vm1928_vm9 = vcmask 1048320   ;;  %s1937_s27 = int_to_ptr.vmem [resolvable:$true] %s1936_s27 }
  0x18   :  { %v128_v14 = vand.u32 4294901760, %v127_v11  ;;  %s2354_s28 = scalar_lea.vmem %s1937_s27, 128  ;;  %p2359_p9 = scmp.lt.s32.totalorder %s1937_s27, %s1937_s27 }
  0x19   :  { %2328 = vset.pattern.permute.xlu0 %v2385_v5  ;;  %2330 = vset.pattern.permute.xlu1 %v2386_v6  ;;  %v121_v13 = vand.u32 4294901760, %v120_v10  ;;  %v2438_v21 = vpack.c.bf16 %v127_v11, %v120_v10  ;;  %p2355_p8 = scmp.ne.s32.totalorder %s1937_s27, %s2354_s28  ;;  %p2360_p10 = scmp.lt.s32.totalorder %s2354_s28, %s2354_s28 }
  0x1a   :  { %503 = vperm.xlu0 %2328, %v26_v2   ;;  %1455 = vperm.xlu1 %2330, %v26_v2   ;;  %v129_v17 = vsub.f32 %v127_v11, %v128_v14 }
  0x1b   :  { %2203 = vmatpush3.bf16.msra.mxu0 %v2424_v9  ;;  %2221 = vmatpush3.bf16.msra.mxu1 %v2424_v9  ;;  %v122_v16 = vsub.f32 %v120_v10, %v121_v13  ;;  %v2440_v22 = vpack.c.bf16 %v128_v14, %v121_v13  ;;  %p2361_p11 = por %p2360_p10, %p2359_p9 }
  0x1c   :  { %2204 = vmatprep.subr.bf16.mxu0 %v2387_v12  ;;  %2222 = vmatprep.subr.bf16.mxu1 %v2387_v12  ;;  %v130_v19 = vand.u32 4294901760, %v129_v17 }
  0x1d   :  { %v123_v18 = vand.u32 4294901760, %v122_v16  ;;  %p2362_p12 = pnand %p2361_p11, %p2355_p8 }
  0x1e   :  { %2331 = vset.pattern.permute.xlu0 %v2386_v6 }
  0x1f   :  { %v2436_v20 = vpack.c.bf16 %v130_v19, %v123_v18 }
  0x94   :  { %v31_v25 = vpop.permute.xlu0 %30  ;;  %v980_v39 = vpop.permute.xlu1 %979 }
  0x95   :  { %vm32_vm2 = vcmp.eq.s32.totalorder %v31_v25, %v28_v24  ;;  %vm981_vm4 = vcmp.eq.s32.totalorder %v980_v39, %v28_v24 }
  0x96   :  { %v2443_v26 = vsel %vm32_vm2, 1.0, %v2389_v15  ;;  %v2481_v41 = vsel %vm981_vm4, 1.0, %v2389_v15 }
  0x97   :  { %v39_v27 = vsel %vm37_vm1, %v2443_v26, 0  ;;  %v987_v42 = vsel %vm37_vm1, %v2481_v41, 0 }
  0x98   :  { %v109_v28 = vsub.f32 %v39_v27, %v39_v27  ;;  %v1057_v44 = vsub.f32 %v987_v42, %v987_v42 }
  0x99   :  { %v504_v29 = vpop.permute.xlu0 %503  ;;  %v1456_v40 = vpop.permute.xlu1 %1455 }
  0x9a   :  { %vm505_vm3 = vcmp.eq.s32.totalorder %v504_v29, %v28_v24  ;;  %v110_v30 = vand.u32 4294901760, %v109_v28  ;;  %vm1457_vm5 = vcmp.eq.s32.totalorder %v1456_v40, %v28_v24  ;;  %v1058_v46 = vand.u32 4294901760, %v1057_v44 }
  0x9b   :  { %v2448_v31 = vsel %vm505_vm3, 1.0, %v2389_v15  ;;  %v2490_v43 = vsel %vm1457_vm5, 1.0, %v2389_v15 }
  0x9c   :  { %v511_v32 = vsel %vm37_vm1, %v2448_v31, 0  ;;  %v111_v33 = vsub.f32 %v109_v28, %v110_v30  ;;  %v1463_v45 = vsel %vm37_vm1, %v2490_v43, 0  ;;  %v1059_v48 = vsub.f32 %v1057_v44, %v1058_v46 }
  0x9d   :  { %v581_v34 = vsub.f32 %v511_v32, %v511_v32  ;;  %v1533_v47 = vsub.f32 %v1463_v45, %v1463_v45 }
  0x9e   :  { %v112_v35 = vand.u32 4294901760, %v111_v33  ;;  %v1060_v50 = vand.u32 4294901760, %v1059_v48 }
  0x9f   :  { %v582_v36 = vand.u32 4294901760, %v581_v34  ;;  %v1534_v49 = vand.u32 4294901760, %v1533_v47 }
  0xa0   :  { %2038 = vmatmul.mubr.f32.vlgmr.msra.gmra.mrb[0].mxu0 %v112_v35 }
  0xa1   :  { %2206 = vmatpush3.bf16.msra.mxu0 %v2436_v20  ;;  %v583_v37 = vsub.f32 %v581_v34, %v582_v36  ;;  %2044 = vmatprep.mubr.msk.f32.mxu0 %vm2388_vm0, %v2389_v15  ;;  %v1535_v51 = vsub.f32 %v1533_v47, %v1534_v49 }
  0xa2   :  { %2207 = vmatprep.subr.bf16.mxu0 %v2387_v12 }
  0xa3   :  { %v584_v38 = vand.u32 4294901760, %v583_v37  ;;  %v1536_v52 = vand.u32 4294901760, %v1535_v51 }
  0xa5   :  { %2080 = vmatmul.mubr.f32.vlgmr.msra.gmra.mrb[0].mxu1 %v584_v38 }
  0xa6   :  { %2224 = vmatpush3.bf16.msra.mxu1 %v2436_v20  ;;  %2086 = vmatprep.mubr.msk.f32.mxu1 %vm2388_vm0, %v2389_v15 }
  0xa7   :  { %2225 = vmatprep.subr.bf16.mxu1 %v2387_v12 }
  0xa8   :  { %2045 = vmatmul.mubr.msk.f32.vlgmr.msra.gmra.mrb[0].mxu0 %vm37_vm1, %v2443_v26 }
  0xa9   :  { %2209 = vmatpush3.bf16.msra.mxu0 %v2438_v21  ;;  %2051 = vmatprep.mubr.msk.f32.mxu0 %vm2388_vm0, %v2389_v15 }
  0xaa   :  { %2210 = vmatprep.subr.bf16.mxu0 %v2387_v12 }
  0xad   :  { %2087 = vmatmul.mubr.msk.f32.vlgmr.msra.gmra.mrb[0].mxu1 %vm37_vm1, %v2448_v31 }
  0xae   :  { %2227 = vmatpush3.bf16.msra.mxu1 %v2438_v21  ;;  %2093 = vmatprep.mubr.msk.f32.mxu1 %vm2388_vm0, %v2389_v15 }
  0xaf   :  { %2228 = vmatprep.subr.bf16.mxu1 %v2387_v12 }
  0xb0   :  { %2052 = vmatmul.mubr.f32.vlgmr.msra.gmra.mrb[0].mxu0 %v109_v28 }
  0xb1   :  { %2212 = vmatpush3.bf16.msra.mxu0 %v2424_v9  ;;  %2058 = vmatprep.mubr.msk.f32.mxu0 %vm2388_vm0, %v2389_v15 }
  0xb2   :  { %2213 = vmatprep.subr.bf16.mxu0 %v2387_v12 }
  0xb5   :  { %2094 = vmatmul.mubr.f32.vlgmr.msra.gmra.mrb[0].mxu1 %v581_v34 }
  0xb6   :  { %2230 = vmatpush3.bf16.msra.mxu1 %v2424_v9  ;;  %2100 = vmatprep.mubr.msk.f32.mxu1 %vm2388_vm0, %v2389_v15 }
  0xb7   :  { %2231 = vmatprep.subr.bf16.mxu1 %v2387_v12 }
  0xb8   :  { %2059 = vmatmul.mubr.f32.vlgmr.msra.gmra.mrb[0].mxu0 %v110_v30 }
  0xb9   :  { %2215 = vmatpush3.bf16.msra.mxu0 %v2440_v22  ;;  %2065 = vmatprep.mubr.msk.f32.mxu0 %vm2388_vm0, %v2389_v15 }
  0xba   :  { %2216 = vmatprep.subr.bf16.mxu0 %v2387_v12 }
  0xbd   :  { %2101 = vmatmul.mubr.f32.vlgmr.msra.gmra.mrb[0].mxu1 %v582_v36 }
  0xbe   :  { %2233 = vmatpush3.bf16.msra.mxu1 %v2440_v22  ;;  %2107 = vmatprep.mubr.msk.f32.mxu1 %vm2388_vm0, %v2389_v15 }
  0xbf   :  { %2234 = vmatprep.subr.bf16.mxu1 %v2387_v12 }
  0xc0   :  { %2066 = vmatmul.mubr.msk.f32.vlgmr.msra.gmra.mrb[0].mxu0 %vm37_vm1, %v2443_v26 }
  0xc1   :  { %2218 = vmatpush3.bf16.msra.mxu0 %v2424_v9  ;;  %2072 = vmatprep.mubr.msk.f32.mxu0 %vm2388_vm0, %v2389_v15 }
  0xc2   :  { %2237 = vmatprep.subr.bf16.mxu0 %v2387_v12 }
  0xc5   :  { %2108 = vmatmul.mubr.msk.f32.vlgmr.msra.gmra.mrb[0].mxu1 %vm37_vm1, %v2448_v31 }
  0xc6   :  { %2236 = vmatpush3.bf16.msra.mxu1 %v2424_v9  ;;  %2114 = vmatprep.mubr.msk.f32.mxu1 %vm2388_vm0, %v2389_v15 }
  0xc7   :  { %2255 = vmatprep.subr.bf16.mxu1 %v2387_v12 }
  0xc8   :  { %2073 = vmatmul.mubr.msk.f32.vlgmr.msra.gmra.mrb[0].mxu0 %vm37_vm1, %v2443_v26 }
  0xc9   :  { %2239 = vmatpush3.bf16.msra.mxu0 %v2424_v9  ;;  %2121 = vmatprep.mubr.msk.f32.mxu0 %vm2388_vm0, %v2389_v15 }
  0xca   :  { %2240 = vmatprep.subr.bf16.mxu0 %v2387_v12 }
  0xcc   :  { %2122 = vmatmul.mubr.f32.vlgmr.msra.gmra.mrb[2].mxu0 %v1060_v50 }
  0xcd   :  { %2115 = vmatmul.mubr.msk.f32.vlgmr.msra.gmra.mrb[0].mxu1 %vm37_vm1, %v2448_v31  ;;  %2242 = vmatpush3.bf16.msra.mxu0 %v2436_v20 }
  0xce   :  { %2257 = vmatpush3.bf16.msra.mxu1 %v2424_v9  ;;  %2163 = vmatprep.mubr.msk.f32.mxu1 %vm2388_vm0, %v2389_v15 }
  0xcf   :  { %2258 = vmatprep.subr.bf16.mxu1 %v2387_v12  ;;  %2128 = vmatprep.mubr.msk.f32.mxu0 %vm2388_vm0, %v2389_v15 }
  0xd0   :  { %2243 = vmatprep.subr.bf16.mxu0 %v2387_v12 }
  0xd1   :  { %2164 = vmatmul.mubr.f32.vlgmr.msra.gmra.mrb[2].mxu1 %v1536_v52 }
  0xd2   :  { %2260 = vmatpush3.bf16.msra.mxu1 %v2436_v20  ;;  %2170 = vmatprep.mubr.msk.f32.mxu1 %vm2388_vm0, %v2389_v15 }
  0xd3   :  { %2261 = vmatprep.subr.bf16.mxu1 %v2387_v12 }
  0xd4   :  { %2129 = vmatmul.mubr.msk.f32.vlgmr.msra.gmra.mrb[2].mxu0 %vm37_vm1, %v2481_v41 }
  0xd5   :  { %2245 = vmatpush3.bf16.msra.mxu0 %v2438_v21  ;;  %2135 = vmatprep.mubr.msk.f32.mxu0 %vm2388_vm0, %v2389_v15 }
  0xd6   :  { %2246 = vmatprep.subr.bf16.mxu0 %v2387_v12 }
  0xd9   :  { %2171 = vmatmul.mubr.msk.f32.vlgmr.msra.gmra.mrb[2].mxu1 %vm37_vm1, %v2490_v43 }
  0xda   :  { %2263 = vmatpush3.bf16.msra.mxu1 %v2438_v21  ;;  %2177 = vmatprep.mubr.msk.f32.mxu1 %vm2388_vm0, %v2389_v15 }
  0xdb   :  { %2264 = vmatprep.subr.bf16.mxu1 %v2387_v12 }
  0xdc   :  { %2136 = vmatmul.mubr.f32.vlgmr.msra.gmra.mrb[2].mxu0 %v1057_v44 }
  0xdd   :  { %2248 = vmatpush3.bf16.msra.mxu0 %v2424_v9  ;;  %2142 = vmatprep.mubr.msk.f32.mxu0 %vm2388_vm0, %v2389_v15 }
  0xde   :  { %2249 = vmatprep.subr.bf16.mxu0 %v2387_v12 }
  0xe1   :  { %2178 = vmatmul.mubr.f32.vlgmr.msra.gmra.mrb[2].mxu1 %v1533_v47 }
  0xe2   :  { %2266 = vmatpush3.bf16.msra.mxu1 %v2424_v9  ;;  %2184 = vmatprep.mubr.msk.f32.mxu1 %vm2388_vm0, %v2389_v15 }
  0xe3   :  { %2267 = vmatprep.subr.bf16.mxu1 %v2387_v12 }
  0xe4   :  { %2143 = vmatmul.mubr.f32.vlgmr.msra.gmra.mrb[2].mxu0 %v1058_v46 }
  0xe5   :  { %2251 = vmatpush3.bf16.msra.mxu0 %v2440_v22  ;;  %2149 = vmatprep.mubr.msk.f32.mxu0 %vm2388_vm0, %v2389_v15 }
  0xe6   :  { %2252 = vmatprep.subr.bf16.mxu0 %v2387_v12 }
  0xe9   :  { %2185 = vmatmul.mubr.f32.vlgmr.msra.gmra.mrb[2].mxu1 %v1534_v49 }
  0xea   :  { %2269 = vmatpush3.bf16.msra.mxu1 %v2440_v22  ;;  %2191 = vmatprep.mubr.msk.f32.mxu1 %vm2388_vm0, %v2389_v15 }
  0xeb   :  { %2270 = vmatprep.subr.bf16.mxu1 %v2387_v12 }
  0xec   :  { %2150 = vmatmul.mubr.msk.f32.vlgmr.msra.gmra.mrb[2].mxu0 %vm37_vm1, %v2481_v41 }
  0xed   :  { %2254 = vmatpush3.bf16.msra.mxu0 %v2424_v9  ;;  %2156 = vmatprep.mubr.msk.f32.mxu0 %vm2388_vm0, %v2389_v15 }
  0xf1   :  { %2192 = vmatmul.mubr.msk.f32.vlgmr.msra.gmra.mrb[2].mxu1 %vm37_vm1, %v2490_v43 }
  0xf2   :  { %2272 = vmatpush3.bf16.msra.mxu1 %v2424_v9  ;;  %2198 = vmatprep.mubr.msk.f32.mxu1 %vm2388_vm0, %v2389_v15 }
  0xf4   :  { %2157 = vmatmul.mubr.msk.f32.vlgmr.msra.gmra.mrb[2].mxu0 %vm37_vm1, %v2481_v41 }
  0xf9   :  { %2199 = vmatmul.mubr.msk.f32.vlgmr.msra.gmra.mrb[2].mxu1 %vm37_vm1, %v2490_v43 }
 0x19b   :  { %v496_v53 = vpop.f32.mrb[0].mxu0 }
 0x19c   :  { %501 = vst.msk [vmem:[#allocation5] sm:$0xff] %vm500_vm6, %v496_v53  ;;  %v2074_v54 = vpop.f32.mrb[1].mxu0 }
 0x1a0   :  { %v968_v55 = vpop.f32.mrb[0].mxu1 }
 0x1a1   :  { %973 = vrot.lane.b32.xlu1 %v968_v55, %s2390_s0  ;;  %v2116_v56 = vpop.f32.mrb[1].mxu1 }
 0x1c7   :  { %v1444_v57 = vpop.f32.mrb[2].mxu0 }
 0x1c8   :  { %1449 = vrot.lane.b32.xlu0 %v1444_v57, %s2391_s1  ;;  %v2158_v58 = vpop.f32.mrb[3].mxu0 }
 0x1cc   :  { %v1920_v59 = vpop.f32.mrb[2].mxu1 }
 0x1cd   :  { %1925 = vrot.lane.b32.xlu1 %v1920_v59, %s2392_s25  ;;  %v2200_v60 = vpop.f32.mrb[3].mxu1 }
 0x213   :  { %v974_v61 = vpop.permute.xlu1 %973 }
 0x214   :  { %977 = vst.msk [vmem:[#allocation5] sm:$0xff] %vm976_vm7, %v974_v61 }
 0x23a   :  { %v1450_v62 = vpop.permute.xlu0 %1449 }
 0x23b   :  { %1453 = vst.msk [vmem:[#allocation5] sm:$0xff] %vm1452_vm8, %v1450_v62 }
 0x23f   :  { %v1926_v63 = vpop.permute.xlu1 %1925 }
 0x240   :  { %1929 = vst.msk [vmem:[#allocation5] sm:$0xff] %vm1928_vm9, %v1926_v63 }
 0x241   :  { %2365 = shalt.err (!%p2362_p12)
}
 0x242   :  { %s2366_s3 = scalar_lea.hbm %s2586_s2, 128 }
 0x243   :  { %p2367_p13 = scmp.ne.s32.totalorder %s2586_s2, %s2366_s3  ;;  %p2370_p0 = scmp.lt.u32.totalorder %s2366_s3, %s2586_s2 }
 0x245   :  { %p2372_p1 = pnand %p2370_p0, %p2367_p13 }
 0x247   :  { %2375 = shalt.err (!%p2372_p1)
}
 0x248   :  { %1939 = dma.vmem_to_hbm [thread:$0]  %s1937_s27, 128, %s2586_s2, [#allocation4]  }
 0x249   :  { %2378 = dma.done.wait [#allocation4], 128  }
 0x24a   :  { %2379 = vsyncadd [#allocation4], 4294967168 }
 0x24b   :  { %1943 = vsyncpa [#allocation3], 1 }
 0x24c   :  { %1944 = vsyncpa [#allocation4], 1 }

// kernel: tpu_custom_call.1
= control target key start
LH: loop header
LB: loop body
LE: loop exit
PB: predicated region body
PF: predicated region fallthrough
CT: control target
= control target key end

     0   :  { %7 = vsyncpa [#allocation3], 0  ;;  %s2584_s0 = inlined_call_operand.vmem [shape: s32[8,4], index: 0, kind: input, shape index: {}]   ;;  %s2585_s1 = inlined_call_operand.hbm [shape: f32[16,32], index: 1, kind: input, shape index: {}]   ;;  %s2586_s2 = inlined_call_operand.hbm [shape: f32[8,128], index: 2, kind: output, shape index: {}]  }
   0x1   :  { %8 = vsyncpa [#allocation4], 0  ;;  %s2380_s9 = smov [#allocation2]   ;;  %s2332_s13 = scalar_lea.hbm %s2585_s1, 256 }
   0x2   :  { %s16_s10 = sshll.u32 %s2380_s9, 4  ;;  %p2333_p0 = scmp.ne.s32.totalorder %s2585_s1, %s2332_s13  ;;  %s17_s10 = int_to_ptr.vmem [resolvable:$true] %s16_s10 }
   0x3   :  { %p2336_p1 = scmp.lt.u32.totalorder %s2332_s13, %s2585_s1 }
   0x5   :  { %p2338_p2 = pnand %p2336_p1, %p2333_p0 }
   0x7   :  { %2341 = shalt.err (!%p2338_p2)
}
   0x8   :  { %s2342_s18 = scalar_lea.vmem %s17_s10, 256  ;;  %p2347_p4 = scmp.lt.s32.totalorder %s17_s10, %s17_s10 }
   0x9   :  { %p2343_p3 = scmp.ne.s32.totalorder %s17_s10, %s2342_s18  ;;  %p2348_p5 = scmp.lt.s32.totalorder %s2342_s18, %s2342_s18 }
   0xb   :  { %p2349_p6 = por %p2348_p5, %p2347_p4 }
   0xd   :  { %p2350_p7 = pnand %p2349_p6, %p2343_p3 }
   0xf   :  { %2353 = shalt.err (!%p2350_p7)
}
  0x10   :  { %s2381_s19 = smov 128   ;;  %s2382_s20 = smov 8  }
  0x11   :  { %22 = dma.hbm_to_vmem [thread:$0]  %s2585_s1, 256, %s17_s10, [#allocation3], %s2381_s19, %s2381_s19, %s2382_s20  }
  0x12   :  { %2376 = dma.done.wait [#allocation3], 256  }
  0x13   :  { %2377 = vsyncadd [#allocation3], 4294967040  ;;  %v2383_v0 = vmov 0   ;;  %v2384_v1 = vmov 2   ;;  %v26_v2 = vld [vmem:[%s2584_s0] sm:$0xff]  ;;  %v36_v4 = vld [vmem:[#allocation2 + $0x8] sm:$0xff]  ;;  %v27_v23 = vlaneseq }
  0x14   :  { %2327 = vset.pattern.permute.xlu0 %v2383_v0  ;;  %2329 = vset.pattern.permute.xlu1 %v2384_v1  ;;  %v35_v3 = vld [vmem:[#allocation2] sm:$0xff]  ;;  %v2385_v5 = vmov 1   ;;  %v2386_v6 = vmov 3   ;;  %v45_v8 = vand.u32 4294901760, %v36_v4  ;;  %v2387_v12 = vmov 0.0|0.0   ;;  %s2390_s0 = smov 32  }
  0x15   :  { %30 = vperm.xlu0 %2327, %v26_v2   ;;  %979 = vperm.xlu1 %2329, %v26_v2   ;;  %v42_v7 = vand.u32 4294901760, %v35_v3  ;;  %vm2388_vm0 = vmmov 0   ;;  %v2389_v15 = vmov 0.0   ;;  %v28_v24 = vand.u32 127, %v27_v23  ;;  %s2391_s1 = smov 64   ;;  %s2392_s25 = smov 96  }
  0x16   :  { %v127_v11 = vsub.f32 %v36_v4, %v45_v8  ;;  %2201 = vmatprep.subr.bf16.mxu0 %v2387_v12  ;;  %2219 = vmatprep.subr.bf16.mxu1 %v2387_v12  ;;  %vm37_vm1 = vcmask 130048   ;;  %vm500_vm6 = vcmask 261120   ;;  %vm976_vm7 = vcmask 523520   ;;  %s2393_s26 = smov [#allocation5]  }
  0x17   :  { %v2424_v9 = vpack.c.bf16 %v45_v8, %v42_v7  ;;  %v120_v10 = vsub.f32 %v35_v3, %v42_v7  ;;  %2037 = vmatprep.mubr.msk.f32.mxu0 %vm2388_vm0, %v2389_v15  ;;  %2079 = vmatprep.mubr.msk.f32.mxu1 %vm2388_vm0, %v2389_v15  ;;  %vm1452_vm8 = vcmask 785920   ;;  %s1936_s27 = sshll.u32 %s2393_s26, 4  ;;  %vm1928_vm9 = vcmask 1048320   ;;  %s1937_s27 = int_to_ptr.vmem [resolvable:$true] %s1936_s27 }
  0x18   :  { %v128_v14 = vand.u32 4294901760, %v127_v11  ;;  %s2354_s28 = scalar_lea.vmem %s1937_s27, 128  ;;  %p2359_p9 = scmp.lt.s32.totalorder %s1937_s27, %s1937_s27 }
  0x19   :  { %2328 = vset.pattern.permute.xlu0 %v2385_v5  ;;  %2330 = vset.pattern.permute.xlu1 %v2386_v6  ;;  %v121_v13 = vand.u32 4294901760, %v120_v10  ;;  %v2438_v21 = vpack.c.bf16 %v127_v11, %v120_v10  ;;  %p2355_p8 = scmp.ne.s32.totalorder %s1937_s27, %s2354_s28  ;;  %p2360_p10 = scmp.lt.s32.totalorder %s2354_s28, %s2354_s28 }
  0x1a   :  { %503 = vperm.xlu0 %2328, %v26_v2   ;;  %1455 = vperm.xlu1 %2330, %v26_v2   ;;  %v129_v17 = vsub.f32 %v127_v11, %v128_v14 }
  0x1b   :  { %2203 = vmatpush3.bf16.msra.mxu0 %v2424_v9  ;;  %2221 = vmatpush3.bf16.msra.mxu1 %v2424_v9  ;;  %v122_v16 = vsub.f32 %v120_v10, %v121_v13  ;;  %v2440_v22 = vpack.c.bf16 %v128_v14, %v121_v13  ;;  %p2361_p11 = por %p2360_p10, %p2359_p9 }
  0x1c   :  { %2204 = vmatprep.subr.bf16.mxu0 %v2387_v12  ;;  %2222 = vmatprep.subr.bf16.mxu1 %v2387_v12  ;;  %v130_v19 = vand.u32 4294901760, %v129_v17 }
  0x1d   :  { %v123_v18 = vand.u32 4294901760, %v122_v16  ;;  %p2362_p12 = pnand %p2361_p11, %p2355_p8 }
  0x1e   :  { %2331 = vset.pattern.permute.xlu0 %v2386_v6 }
  0x1f   :  { %v2436_v20 = vpack.c.bf16 %v130_v19, %v123_v18 }
  0x94   :  { %v31_v25 = vpop.permute.xlu0 %30  ;;  %v980_v39 = vpop.permute.xlu1 %979 }
  0x95   :  { %vm32_vm2 = vcmp.eq.s32.totalorder %v31_v25, %v28_v24  ;;  %vm981_vm4 = vcmp.eq.s32.totalorder %v980_v39, %v28_v24 }
  0x96   :  { %v2443_v26 = vsel %vm32_vm2, 1.0, %v2389_v15  ;;  %v2481_v41 = vsel %vm981_vm4, 1.0, %v2389_v15 }
  0x97   :  { %v39_v27 = vsel %vm37_vm1, %v2443_v26, 0  ;;  %v987_v42 = vsel %vm37_vm1, %v2481_v41, 0 }
  0x98   :  { %v109_v28 = vsub.f32 %v39_v27, %v39_v27  ;;  %v1057_v44 = vsub.f32 %v987_v42, %v987_v42 }
  0x99   :  { %v504_v29 = vpop.permute.xlu0 %503  ;;  %v1456_v40 = vpop.permute.xlu1 %1455 }
  0x9a   :  { %vm505_vm3 = vcmp.eq.s32.totalorder %v504_v29, %v28_v24  ;;  %v110_v30 = vand.u32 4294901760, %v109_v28  ;;  %vm1457_vm5 = vcmp.eq.s32.totalorder %v1456_v40, %v28_v24  ;;  %v1058_v46 = vand.u32 4294901760, %v1057_v44 }
  0x9b   :  { %v2448_v31 = vsel %vm505_vm3, 1.0, %v2389_v15  ;;  %v2490_v43 = vsel %vm1457_vm5, 1.0, %v2389_v15 }
  0x9c   :  { %v511_v32 = vsel %vm37_vm1, %v2448_v31, 0  ;;  %v111_v33 = vsub.f32 %v109_v28, %v110_v30  ;;  %v1463_v45 = vsel %vm37_vm1, %v2490_v43, 0  ;;  %v1059_v48 = vsub.f32 %v1057_v44, %v1058_v46 }
  0x9d   :  { %v581_v34 = vsub.f32 %v511_v32, %v511_v32  ;;  %v1533_v47 = vsub.f32 %v1463_v45, %v1463_v45 }
  0x9e   :  { %v112_v35 = vand.u32 4294901760, %v111_v33  ;;  %v1060_v50 = vand.u32 4294901760, %v1059_v48 }
  0x9f   :  { %v582_v36 = vand.u32 4294901760, %v581_v34  ;;  %v1534_v49 = vand.u32 4294901760, %v1533_v47 }
  0xa0   :  { %2038 = vmatmul.mubr.f32.vlgmr.msra.gmra.mrb[0].mxu0 %v112_v35 }
  0xa1   :  { %2206 = vmatpush3.bf16.msra.mxu0 %v2436_v20  ;;  %v583_v37 = vsub.f32 %v581_v34, %v582_v36  ;;  %2044 = vmatprep.mubr.msk.f32.mxu0 %vm2388_vm0, %v2389_v15  ;;  %v1535_v51 = vsub.f32 %v1533_v47, %v1534_v49 }
  0xa2   :  { %2207 = vmatprep.subr.bf16.mxu0 %v2387_v12 }
  0xa3   :  { %v584_v38 = vand.u32 4294901760, %v583_v37  ;;  %v1536_v52 = vand.u32 4294901760, %v1535_v51 }
  0xa5   :  { %2080 = vmatmul.mubr.f32.vlgmr.msra.gmra.mrb[0].mxu1 %v584_v38 }
  0xa6   :  { %2224 = vmatpush3.bf16.msra.mxu1 %v2436_v20  ;;  %2086 = vmatprep.mubr.msk.f32.mxu1 %vm2388_vm0, %v2389_v15 }
  0xa7   :  { %2225 = vmatprep.subr.bf16.mxu1 %v2387_v12 }
  0xa8   :  { %2045 = vmatmul.mubr.msk.f32.vlgmr.msra.gmra.mrb[0].mxu0 %vm37_vm1, %v2443_v26 }
  0xa9   :  { %2209 = vmatpush3.bf16.msra.mxu0 %v2438_v21  ;;  %2051 = vmatprep.mubr.msk.f32.mxu0 %vm2388_vm0, %v2389_v15 }
  0xaa   :  { %2210 = vmatprep.subr.bf16.mxu0 %v2387_v12 }
  0xad   :  { %2087 = vmatmul.mubr.msk.f32.vlgmr.msra.gmra.mrb[0].mxu1 %vm37_vm1, %v2448_v31 }
  0xae   :  { %2227 = vmatpush3.bf16.msra.mxu1 %v2438_v21  ;;  %2093 = vmatprep.mubr.msk.f32.mxu1 %vm2388_vm0, %v2389_v15 }
  0xaf   :  { %2228 = vmatprep.subr.bf16.mxu1 %v2387_v12 }
  0xb0   :  { %2052 = vmatmul.mubr.f32.vlgmr.msra.gmra.mrb[0].mxu0 %v109_v28 }
  0xb1   :  { %2212 = vmatpush3.bf16.msra.mxu0 %v2424_v9  ;;  %2058 = vmatprep.mubr.msk.f32.mxu0 %vm2388_vm0, %v2389_v15 }
  0xb2   :  { %2213 = vmatprep.subr.bf16.mxu0 %v2387_v12 }
  0xb5   :  { %2094 = vmatmul.mubr.f32.vlgmr.msra.gmra.mrb[0].mxu1 %v581_v34 }
  0xb6   :  { %2230 = vmatpush3.bf16.msra.mxu1 %v2424_v9  ;;  %2100 = vmatprep.mubr.msk.f32.mxu1 %vm2388_vm0, %v2389_v15 }
  0xb7   :  { %2231 = vmatprep.subr.bf16.mxu1 %v2387_v12 }
  0xb8   :  { %2059 = vmatmul.mubr.f32.vlgmr.msra.gmra.mrb[0].mxu0 %v110_v30 }
  0xb9   :  { %2215 = vmatpush3.bf16.msra.mxu0 %v2440_v22  ;;  %2065 = vmatprep.mubr.msk.f32.mxu0 %vm2388_vm0, %v2389_v15 }
  0xba   :  { %2216 = vmatprep.subr.bf16.mxu0 %v2387_v12 }
  0xbd   :  { %2101 = vmatmul.mubr.f32.vlgmr.msra.gmra.mrb[0].mxu1 %v582_v36 }
  0xbe   :  { %2233 = vmatpush3.bf16.msra.mxu1 %v2440_v22  ;;  %2107 = vmatprep.mubr.msk.f32.mxu1 %vm2388_vm0, %v2389_v15 }
  0xbf   :  { %2234 = vmatprep.subr.bf16.mxu1 %v2387_v12 }
  0xc0   :  { %2066 = vmatmul.mubr.msk.f32.vlgmr.msra.gmra.mrb[0].mxu0 %vm37_vm1, %v2443_v26 }
  0xc1   :  { %2218 = vmatpush3.bf16.msra.mxu0 %v2424_v9  ;;  %2072 = vmatprep.mubr.msk.f32.mxu0 %vm2388_vm0, %v2389_v15 }
  0xc2   :  { %2237 = vmatprep.subr.bf16.mxu0 %v2387_v12 }
  0xc5   :  { %2108 = vmatmul.mubr.msk.f32.vlgmr.msra.gmra.mrb[0].mxu1 %vm37_vm1, %v2448_v31 }
  0xc6   :  { %2236 = vmatpush3.bf16.msra.mxu1 %v2424_v9  ;;  %2114 = vmatprep.mubr.msk.f32.mxu1 %vm2388_vm0, %v2389_v15 }
  0xc7   :  { %2255 = vmatprep.subr.bf16.mxu1 %v2387_v12 }
  0xc8   :  { %2073 = vmatmul.mubr.msk.f32.vlgmr.msra.gmra.mrb[0].mxu0 %vm37_vm1, %v2443_v26 }
  0xc9   :  { %2239 = vmatpush3.bf16.msra.mxu0 %v2424_v9  ;;  %2121 = vmatprep.mubr.msk.f32.mxu0 %vm2388_vm0, %v2389_v15 }
  0xca   :  { %2240 = vmatprep.subr.bf16.mxu0 %v2387_v12 }
  0xcc   :  { %2122 = vmatmul.mubr.f32.vlgmr.msra.gmra.mrb[2].mxu0 %v1060_v50 }
  0xcd   :  { %2115 = vmatmul.mubr.msk.f32.vlgmr.msra.gmra.mrb[0].mxu1 %vm37_vm1, %v2448_v31  ;;  %2242 = vmatpush3.bf16.msra.mxu0 %v2436_v20 }
  0xce   :  { %2257 = vmatpush3.bf16.msra.mxu1 %v2424_v9  ;;  %2163 = vmatprep.mubr.msk.f32.mxu1 %vm2388_vm0, %v2389_v15 }
  0xcf   :  { %2258 = vmatprep.subr.bf16.mxu1 %v2387_v12  ;;  %2128 = vmatprep.mubr.msk.f32.mxu0 %vm2388_vm0, %v2389_v15 }
  0xd0   :  { %2243 = vmatprep.subr.bf16.mxu0 %v2387_v12 }
  0xd1   :  { %2164 = vmatmul.mubr.f32.vlgmr.msra.gmra.mrb[2].mxu1 %v1536_v52 }
  0xd2   :  { %2260 = vmatpush3.bf16.msra.mxu1 %v2436_v20  ;;  %2170 = vmatprep.mubr.msk.f32.mxu1 %vm2388_vm0, %v2389_v15 }
  0xd3   :  { %2261 = vmatprep.subr.bf16.mxu1 %v2387_v12 }
  0xd4   :  { %2129 = vmatmul.mubr.msk.f32.vlgmr.msra.gmra.mrb[2].mxu0 %vm37_vm1, %v2481_v41 }
  0xd5   :  { %2245 = vmatpush3.bf16.msra.mxu0 %v2438_v21  ;;  %2135 = vmatprep.mubr.msk.f32.mxu0 %vm2388_vm0, %v2389_v15 }
  0xd6   :  { %2246 = vmatprep.subr.bf16.mxu0 %v2387_v12 }
  0xd9   :  { %2171 = vmatmul.mubr.msk.f32.vlgmr.msra.gmra.mrb[2].mxu1 %vm37_vm1, %v2490_v43 }
  0xda   :  { %2263 = vmatpush3.bf16.msra.mxu1 %v2438_v21  ;;  %2177 = vmatprep.mubr.msk.f32.mxu1 %vm2388_vm0, %v2389_v15 }
  0xdb   :  { %2264 = vmatprep.subr.bf16.mxu1 %v2387_v12 }
  0xdc   :  { %2136 = vmatmul.mubr.f32.vlgmr.msra.gmra.mrb[2].mxu0 %v1057_v44 }
  0xdd   :  { %2248 = vmatpush3.bf16.msra.mxu0 %v2424_v9  ;;  %2142 = vmatprep.mubr.msk.f32.mxu0 %vm2388_vm0, %v2389_v15 }
  0xde   :  { %2249 = vmatprep.subr.bf16.mxu0 %v2387_v12 }
  0xe1   :  { %2178 = vmatmul.mubr.f32.vlgmr.msra.gmra.mrb[2].mxu1 %v1533_v47 }
  0xe2   :  { %2266 = vmatpush3.bf16.msra.mxu1 %v2424_v9  ;;  %2184 = vmatprep.mubr.msk.f32.mxu1 %vm2388_vm0, %v2389_v15 }
  0xe3   :  { %2267 = vmatprep.subr.bf16.mxu1 %v2387_v12 }
  0xe4   :  { %2143 = vmatmul.mubr.f32.vlgmr.msra.gmra.mrb[2].mxu0 %v1058_v46 }
  0xe5   :  { %2251 = vmatpush3.bf16.msra.mxu0 %v2440_v22  ;;  %2149 = vmatprep.mubr.msk.f32.mxu0 %vm2388_vm0, %v2389_v15 }
  0xe6   :  { %2252 = vmatprep.subr.bf16.mxu0 %v2387_v12 }
  0xe9   :  { %2185 = vmatmul.mubr.f32.vlgmr.msra.gmra.mrb[2].mxu1 %v1534_v49 }
  0xea   :  { %2269 = vmatpush3.bf16.msra.mxu1 %v2440_v22  ;;  %2191 = vmatprep.mubr.msk.f32.mxu1 %vm2388_vm0, %v2389_v15 }
  0xeb   :  { %2270 = vmatprep.subr.bf16.mxu1 %v2387_v12 }
  0xec   :  { %2150 = vmatmul.mubr.msk.f32.vlgmr.msra.gmra.mrb[2].mxu0 %vm37_vm1, %v2481_v41 }
  0xed   :  { %2254 = vmatpush3.bf16.msra.mxu0 %v2424_v9  ;;  %2156 = vmatprep.mubr.msk.f32.mxu0 %vm2388_vm0, %v2389_v15 }
  0xf1   :  { %2192 = vmatmul.mubr.msk.f32.vlgmr.msra.gmra.mrb[2].mxu1 %vm37_vm1, %v2490_v43 }
  0xf2   :  { %2272 = vmatpush3.bf16.msra.mxu1 %v2424_v9  ;;  %2198 = vmatprep.mubr.msk.f32.mxu1 %vm2388_vm0, %v2389_v15 }
  0xf4   :  { %2157 = vmatmul.mubr.msk.f32.vlgmr.msra.gmra.mrb[2].mxu0 %vm37_vm1, %v2481_v41 }
  0xf9   :  { %2199 = vmatmul.mubr.msk.f32.vlgmr.msra.gmra.mrb[2].mxu1 %vm37_vm1, %v2490_v43 }
 0x19b   :  { %v496_v53 = vpop.f32.mrb[0].mxu0 }
 0x19c   :  { %501 = vst.msk [vmem:[#allocation5] sm:$0xff] %vm500_vm6, %v496_v53  ;;  %v2074_v54 = vpop.f32.mrb[1].mxu0 }
 0x1a0   :  { %v968_v55 = vpop.f32.mrb[0].mxu1 }
 0x1a1   :  { %973 = vrot.lane.b32.xlu1 %v968_v55, %s2390_s0  ;;  %v2116_v56 = vpop.f32.mrb[1].mxu1 }
 0x1c7   :  { %v1444_v57 = vpop.f32.mrb[2].mxu0 }
 0x1c8   :  { %1449 = vrot.lane.b32.xlu0 %v1444_v57, %s2391_s1  ;;  %v2158_v58 = vpop.f32.mrb[3].mxu0 }
 0x1cc   :  { %v1920_v59 = vpop.f32.mrb[2].mxu1 }
 0x1cd   :  { %1925 = vrot.lane.b32.xlu1 %v1920_v59, %s2392_s25  ;;  %v2200_v60 = vpop.f32.mrb[3].mxu1 }
 0x213   :  { %v974_v61 = vpop.permute.xlu1 %973 }
 0x214   :  { %977 = vst.msk [vmem:[#allocation5] sm:$0xff] %vm976_vm7, %v974_v61 }
 0x23a   :  { %v1450_v62 = vpop.permute.xlu0 %1449 }
 0x23b   :  { %1453 = vst.msk [vmem:[#allocation5] sm:$0xff] %vm1452_vm8, %v1450_v62 }
 0x23f   :  { %v1926_v63 = vpop.permute.xlu1 %1925 }
 0x240   :  { %1929 = vst.msk [vmem:[#allocation5] sm:$0xff] %vm1928_vm9, %v1926_v63 }
 0x241   :  { %2365 = shalt.err (!%p2362_p12)
}
 0x242   :  { %s2366_s3 = scalar_lea.hbm %s2586_s2, 128 }
 0x243   :  { %p2367_p13 = scmp.ne.s32.totalorder %s2586_s2, %s2366_s3  ;;  %p2370_p0 = scmp.lt.u32.totalorder %s2366_s3, %s2586_s2 }
 0x245   :  { %p2372_p1 = pnand %p2370_p0, %p2367_p13 }
 0x247   :  { %2375 = shalt.err (!%p2372_p1)
}
 0x248   :  { %1939 = dma.vmem_to_hbm [thread:$0]  %s1937_s27, 128, %s2586_s2, [#allocation4]  }
 0x249   :  { %2378 = dma.done.wait [#allocation4], 128  }
 0x24a   :  { %2379 = vsyncadd [#allocation4], 4294967168 }
 0x24b   :  { %1943 = vsyncpa [#allocation3], 1 }
 0x24c   :  { %1944 = vsyncpa [#allocation4], 1 }

</bundles_post_ra>
